<compile_context>
chip_gen: v6e
topology: v6e:2x2x1
jax: 0.10.0
libtpu: 0.0.40
codegen_flags: <defaults>
</compile_context>

<pallas_src>
import functools

import numpy as np

import jax
import jax.numpy as jnp
from jax.experimental import pallas as pl
from jax.experimental.pallas import tpu as pltpu


def _round_up(x, m):
    return -(-x // m) * m


def _tpu_config():
    """Per-generation (nsplit, split_semantics, vmem_budget_bytes, vmem_limit_bytes)."""
    kind = ""
    try:
        kind = jax.devices()[0].device_kind.lower()
    except Exception:
        pass
    mib = 1024 * 1024
    if "v7" in kind:
        # 2 TensorCores/chip, 64 MiB VMEM per TC: real core split + smaller tiles.
        return 2, pltpu.CORE_PARALLEL, 20 * mib, 40 * mib
    if ("v4" in kind) or ("v5p" in kind):
        # Megacore chips: "parallel" grid axes shard across the 2 cores.
        return 2, pltpu.PARALLEL, 40 * mib, 64 * mib
    # v5e / v6e (single TensorCore, 128 MiB VMEM) and unknown chips.
    return 1, pltpu.PARALLEL, 40 * mib, 64 * mib


# -----------------------------------------------------------------------------
# Training path: mask_rcnn_loss hot loop
# -----------------------------------------------------------------------------
def _mask_loss_kernel(prec_ref, pred_ref, gt_ref, bnd_ref, ovl_ref, roi_ref, out_ref,
                      *, hw_valid):
    """Batched weighted BCE-with-logits partial sums.

    prec_ref: SMEM (3,)          exp(-log_vars)
    pred_ref: VMEM (TB, HWp)     gathered logits of the gt class (streamed dtype)
    gt_ref  : VMEM (TB, HWp)     gt mask ({0,1})
    bnd_ref : VMEM (TB, HWp)     boundary penalty weight (zero in padded rows/lanes)
    ovl_ref : VMEM (TB, HWp)     overlap penalty weight  (zero in padded rows/lanes)
    roi_ref : VMEM (TB, 1)       roi penalty weight (broadcasts over HWp)
    out_ref : VMEM (8, HWp) f32  per-split vector accumulator
    """
    k = pl.program_id(1)

    @pl.when(k == 0)
    def _():
        out_ref[...] = jnp.zeros_like(out_ref)

    x = pred_ref[...].astype(jnp.float32)          # (TB, HWp)
    y = gt_ref[...].astype(jnp.float32)            # (TB, HWp)

    # Numerically-stable binary_cross_entropy_with_logits, reduction='none'
    bce = jnp.maximum(x, 0.0) - x * y + jnp.log1p(jnp.exp(-jnp.abs(x)))

    p0, p1, p2 = prec_ref[0], prec_ref[1], prec_ref[2]
    w = (p0 * bnd_ref[...].astype(jnp.float32)
         + p1 * roi_ref[...].astype(jnp.float32)   # (TB, 1) broadcasts over HWp
         + p2 * ovl_ref[...].astype(jnp.float32))

    tb, hw_pad = x.shape
    if hw_valid != hw_pad:
        # roi broadcasts into padded lanes (bnd/ovl are zero-padded there); mask out.
        lane = jax.lax.broadcasted_iota(jnp.int32, (tb, hw_pad), 1)
        w = jnp.where(lane < hw_valid, w, 0.0)

    # Fold rows into the (8, HWp) accumulator: reducing the leading axis is pure
    # elementwise VPU adds (no cross-lane movement). The single cross-lane reduce of
    # the tiny partials array happens in the wrapper.
    contrib = (bce * w).reshape(tb // 8, 8, hw_pad)
    out_ref[...] += jnp.sum(contrib, axis=0)


def mask_rcnn_loss_pallas(pred_mask_logits, gt_classes, gt_masks,
                          boundary_penalty, roi_penalty, overlap_penalty, log_vars,
                          *, stream_dtype=jnp.bfloat16, max_block_rows=1024):
    """pred_mask_logits: (B, C, H, W); returns scalar f32 loss.

    Matches torch.mean(weighted_mask_loss) from BaseMaskRCNNHead.mask_rcnn_loss.
    """
    B, C, H, W = pred_mask_logits.shape
    if B == 0:
        return jnp.sum(pred_mask_logits) * 0.0
    HW = H * W
    hw_pad = _round_up(HW, 128)
    cls_agnostic = (C == 1)
    cls_idx = (jnp.zeros((B,), jnp.int32) if cls_agnostic
               else gt_classes.astype(jnp.int32))

    # Class-channel gather done once in XLA (batched (TB, HWp) Pallas tiling beats
    # per-mask grid steps at these HW sizes); bf16 cast fuses into the gather's write.
    pred_flat = pred_mask_logits.reshape(B, C, HW)
    pred_sel = jnp.take_along_axis(pred_flat, cls_idx[:, None, None], axis=1)[:, 0]
    pred_sel = pred_sel.astype(stream_dtype)
    gt = gt_masks.reshape(B, HW).astype(stream_dtype)           # {0,1}: lossless in bf16
    bnd = boundary_penalty.reshape(B, HW).astype(stream_dtype)
    ovl = overlap_penalty.reshape(B, HW).astype(stream_dtype)
    roi = roi_penalty.reshape(B, 1).astype(jnp.float32)         # tiny block, keep f32

    nsplit, split_sem, vmem_budget, vmem_limit = _tpu_config()

    # Lane padding to a multiple of 128 (padded lanes are masked inside the kernel).
    if hw_pad != HW:
        def pad_lanes(a):
            return jnp.pad(a, ((0, 0), (0, hw_pad - HW)))
        pred_sel, gt, bnd, ovl = map(pad_lanes, (pred_sel, gt, bnd, ovl))

    # Tile rows from the per-generation VMEM budget: 4 streamed (TB, HWp) arrays,
    # double-buffered, plus ~3 f32 temporaries alive inside the kernel.
    sb = np.dtype(stream_dtype).itemsize
    per_row = hw_pad * (2 * 4 * sb + 3 * 4) + 32
    tb_budget = max(8, min(max_block_rows, (vmem_budget // per_row) // 8 * 8))

    per_split = -(-B // nsplit)
    tb = min(tb_budget, max(8, _round_up(per_split, 8)))
    blocks_per_split = -(-per_split // tb)
    b_pad = nsplit * blocks_per_split * tb

    if b_pad != B:
        def pad_rows(a):
            return jnp.pad(a, ((0, b_pad - B), (0, 0)))
        # Padded rows have zero bnd/ovl/roi -> zero weight -> zero contribution.
        pred_sel, gt, bnd, ovl, roi = map(pad_rows, (pred_sel, gt, bnd, ovl, roi))

    prec = jnp.exp(-log_vars).astype(jnp.float32)               # 3 scalars -> SMEM

    row_spec = pl.BlockSpec((tb, hw_pad), lambda s, k, prec: (s * blocks_per_split + k, 0))
    roi_spec = pl.BlockSpec((tb, 1), lambda s, k, prec: (s * blocks_per_split + k, 0))

    grid_spec = pltpu.PrefetchScalarGridSpec(
        num_scalar_prefetch=1,
        grid=(nsplit, blocks_per_split),
        in_specs=[row_spec, row_spec, row_spec, row_spec, roi_spec],
        out_specs=pl.BlockSpec((8, hw_pad), lambda s, k, prec: (s, 0)),
    )

    partials = pl.pallas_call(
        functools.partial(_mask_loss_kernel, hw_valid=HW),
        out_shape=jax.ShapeDtypeStruct((nsplit * 8, hw_pad), jnp.float32),
        grid_spec=grid_spec,
        compiler_params=pltpu.CompilerParams(
            dimension_semantics=(split_sem, pltpu.ARBITRARY),
            vmem_limit_bytes=vmem_limit),
    )(prec, pred_sel, gt, bnd, ovl, roi)

    # Single cross-lane reduce of the small (nsplit*8, HWp) partials array.
    total = jnp.sum(partials)
    lv_sum = jnp.sum(log_vars.astype(jnp.float32))
    return total / float(B * H * W) + lv_sum                    # torch.mean(weighted)


# -----------------------------------------------------------------------------
# Inference path: mask_rcnn_inference (class gather + sigmoid)
# -----------------------------------------------------------------------------
def _mask_inference_kernel(pred_ref, out_ref):
    out_ref[...] = jax.nn.sigmoid(pred_ref[...].astype(jnp.float32)).astype(out_ref.dtype)


def mask_rcnn_inference_pallas(pred_mask_logits, pred_classes, *,
                               out_dtype=jnp.bfloat16, max_block_rows=1024):
    """pred_mask_logits: (B, C, H, W) -> per-class probs (B, 1, H, W) in out_dtype."""
    B, C, H, W = pred_mask_logits.shape
    HW = H * W
    hw_pad = _round_up(HW, 128)
    cls_agnostic = (C == 1)
    cls_idx = (jnp.zeros((B,), jnp.int32) if cls_agnostic
               else pred_classes.astype(jnp.int32))

    pred_flat = pred_mask_logits.reshape(B, C, HW)
    pred_sel = jnp.take_along_axis(pred_flat, cls_idx[:, None, None], axis=1)[:, 0]
    if hw_pad != HW:
        pred_sel = jnp.pad(pred_sel, ((0, 0), (0, hw_pad - HW)))

    nsplit, split_sem, vmem_budget, vmem_limit = _tpu_config()
    in_b = np.dtype(pred_sel.dtype).itemsize
    out_b = np.dtype(out_dtype).itemsize
    per_row = hw_pad * (2 * (in_b + out_b) + 4) + 32
    tb_budget = max(8, min(max_block_rows, (vmem_budget // per_row) // 8 * 8))

    per_split = -(-B // nsplit)
    tb = min(tb_budget, max(8, _round_up(per_split, 8)))
    blocks_per_split = -(-per_split // tb)
    b_pad = nsplit * blocks_per_split * tb
    if b_pad != B:
        pred_sel = jnp.pad(pred_sel, ((0, b_pad - B), (0, 0)))

    out = pl.pallas_call(
        _mask_inference_kernel,
        out_shape=jax.ShapeDtypeStruct((b_pad, hw_pad), out_dtype),
        grid=(nsplit, blocks_per_split),
        in_specs=[pl.BlockSpec((tb, hw_pad), lambda s, k: (s * blocks_per_split + k, 0))],
        out_specs=pl.BlockSpec((tb, hw_pad), lambda s, k: (s * blocks_per_split + k, 0)),
        compiler_params=pltpu.CompilerParams(
            dimension_semantics=(split_sem, pltpu.ARBITRARY),
            vmem_limit_bytes=vmem_limit),
    )(pred_sel)
    return out[:B, :HW].reshape(B, 1, H, W)


# -----------------------------------------------------------------------------
# Module wrapper (forward semantics of BaseMaskRCNNHead)
# -----------------------------------------------------------------------------
class BaseMaskRCNNHeadPallas:
    def __init__(self, vis_period=0):
        self.vis_period = vis_period
        # nn.Parameter(torch.zeros(3)) -- perturbed so the precision weights aren't 1.
        self.log_vars = jnp.array([0.1, -0.2, 0.05], dtype=jnp.float32)
        self.training = True

    def layers(self, x):
        # TODO(synk): layers() raises NotImplementedError in BaseMaskRCNNHead (defined
        # by subclasses); the demo treats the ROI features as the mask logits directly.
        return x

    def forward(self, x, instances):
        x = self.layers(x)
        if self.training:
            # TODO(synk): cv2 contour boundary penalty, PolygonMasks.crop_and_resize,
            # EventStorage metrics/vis, and ZipFile/drive checkpointing are host-side
            # side effects; penalty tensors arrive precomputed & dense.
            loss = mask_rcnn_loss_pallas(
                x,
                instances["gt_classes"],
                instances["gt_masks"],
                instances["boundary_penalty"],
                instances["roi_penalty"],
                instances["overlap_penalty"],
                self.log_vars,
            )
            return {"loss_mask": loss}
        probs = mask_rcnn_inference_pallas(x, instances["pred_classes"])
        instances = dict(instances)
        instances["pred_masks"] = probs
        return instances


# -----------------------------------------------------------------------------
# Reference (plain JAX) for correctness checking
# -----------------------------------------------------------------------------
def _ref_loss(pred, gt_classes, gt_masks, bnd, roi, ovl, log_vars, cast_dtype=None):
    """cast_dtype optionally quantizes the streamed tensors exactly like the Pallas
    wrapper does (matched-precision comparison)."""
    B = pred.shape[0]
    x = pred[jnp.arange(B), gt_classes]                        # (B,H,W)
    y = gt_masks
    b, o = bnd, ovl
    if cast_dtype is not None:
        x, y, b, o = (a.astype(cast_dtype) for a in (x, y, b, o))
    x, y, b, o = (a.astype(jnp.float32) for a in (x, y, b, o))
    r = roi.astype(jnp.float32)
    bce = jnp.maximum(x, 0.0) - x * y + jnp.log1p(jnp.exp(-jnp.abs(x)))
    lv = log_vars
    w = jnp.exp(-lv[0]) * (b * bce) + lv[0]
    w = w + jnp.exp(-lv[1]) * (r * bce) + lv[1]
    w = w + jnp.exp(-lv[2]) * (o * bce) + lv[2]
    return jnp.mean(w)


def _ref_inference(pred, pred_classes):
    B = pred.shape[0]
    return jax.nn.sigmoid(pred[jnp.arange(B), pred_classes])[:, None]


if __name__ == "__main__":
    key = jax.random.PRNGKey(0)
    # B masks, C foreground classes, 28x28 mask predictions (Mask R-CNN default);
    # HW=784 exercises lane padding to 896, B=6 exercises row padding to 8.
    B, C, H, W = 6, 4, 28, 28

    k1, k2, k3, k4, k5, k6, k7 = jax.random.split(key, 7)
    pred_mask_logits = jax.random.normal(k1, (B, C, H, W), dtype=jnp.float32)
    gt_classes = jax.random.randint(k2, (B,), 0, C, dtype=jnp.int32)
    gt_masks = (jax.random.uniform(k3, (B, H, W)) > 0.5).astype(jnp.float32)
    boundary_penalty = jax.random.uniform(k4, (B, H, W), minval=0.5, maxval=3.0)
    roi_penalty = jnp.round(jax.random.uniform(k5, (B, 1, 1), minval=1.0, maxval=4.0))
    overlap_penalty = jax.random.uniform(k6, (B, H, W), minval=1.0, maxval=2.0)
    pred_classes = jax.random.randint(k7, (B,), 0, C, dtype=jnp.int32)

    head = BaseMaskRCNNHeadPallas(vis_period=0)

    # --- training forward (default bf16 streaming) ---
    head.training = True
    train_instances = {
        "gt_classes": gt_classes,
        "gt_masks": gt_masks,
        "boundary_penalty": boundary_penalty,
        "roi_penalty": roi_penalty,
        "overlap_penalty": overlap_penalty,
    }
    losses = head.forward(pred_mask_logits, train_instances)
    loss = jax.block_until_ready(losses["loss_mask"])

    ref_bf16 = _ref_loss(pred_mask_logits, gt_classes, gt_masks, boundary_penalty,
                         roi_penalty, overlap_penalty, head.log_vars,
                         cast_dtype=jnp.bfloat16)
    ref_f32 = _ref_loss(pred_mask_logits, gt_classes, gt_masks, boundary_penalty,
                        roi_penalty, overlap_penalty, head.log_vars)
    assert jnp.allclose(loss, ref_bf16, rtol=1e-4, atol=1e-4), (loss, ref_bf16)
    assert jnp.allclose(loss, ref_f32, rtol=5e-2, atol=5e-2), (loss, ref_f32)

    # --- training forward, full-f32 streaming path (tight numerical check) ---
    loss32 = jax.block_until_ready(mask_rcnn_loss_pallas(
        pred_mask_logits, gt_classes, gt_masks, boundary_penalty, roi_penalty,
        overlap_penalty, head.log_vars, stream_dtype=jnp.float32))
    assert jnp.allclose(loss32, ref_f32, rtol=1e-5, atol=1e-5), (loss32, ref_f32)

    # --- inference forward (bf16 probabilities) ---
    head.training = False
    out = head.forward(pred_mask_logits, {"pred_classes": pred_classes})
    masks = jax.block_until_ready(out["pred_masks"])
    masks_ref = _ref_inference(pred_mask_logits, pred_classes)
    assert masks.shape == (B, 1, H, W)
    assert masks.dtype == jnp.bfloat16
    assert jnp.allclose(masks.astype(jnp.float32), masks_ref, atol=5e-3)

    # --- inference, f32-output variant (tight numerical check) ---
    masks32 = jax.block_until_ready(mask_rcnn_inference_pallas(
        pred_mask_logits, pred_classes, out_dtype=jnp.float32))
    assert jnp.allclose(masks32, masks_ref, rtol=1e-5, atol=1e-5)

    print("KERNEL_OK")
</pallas_src>

<mosaic_0001>
module attributes {stable_mosaic.version = 11 : i64} {
  func.func @_mask_loss_kernel(%arg0: i32, %arg1: i32, %arg2: memref<3xf32, #tpu.memory_space<smem>>, %arg3: memref<8x896xbf16, #tpu.memory_space<vmem>>, %arg4: memref<8x896xbf16, #tpu.memory_space<vmem>>, %arg5: memref<8x896xbf16, #tpu.memory_space<vmem>>, %arg6: memref<8x896xbf16, #tpu.memory_space<vmem>>, %arg7: memref<8x1xf32, #tpu.memory_space<vmem>>, %arg8: memref<8x896xf32, #tpu.memory_space<vmem>>) attributes {dimension_semantics = [#tpu.dimension_semantics<parallel>, #tpu.dimension_semantics<arbitrary>], iteration_bounds = array<i64: 1, 1>, scalar_prefetch = 1 : i64, scratch_operands = 0 : i64, tpu.core_type = #tpu.core_type<tc>, window_params = [{transform_indices = @transform_0, window_bounds = array<i64: 8, 896>}, {transform_indices = @transform_1, window_bounds = array<i64: 8, 896>}, {transform_indices = @transform_2, window_bounds = array<i64: 8, 896>}, {transform_indices = @transform_3, window_bounds = array<i64: 8, 896>}, {transform_indices = @transform_4, window_bounds = array<i64: 8, 1>}, {transform_indices = @transform_5, window_bounds = array<i64: 8, 896>}]} {
    %c0_i32 = arith.constant 0 : i32
    %0 = arith.cmpi eq, %arg1, %c0_i32 : i32
    %1 = arith.extui %0 : i1 to i32
    %c0_i32_0 = arith.constant 0 : i32
    %2 = arith.cmpi ne, %1, %c0_i32_0 : i32
    scf.if %2 {
      %cst_18 = arith.constant 0.000000e+00 : f32
      %45 = vector.broadcast %cst_18 : f32 to vector<8x896xf32>
      %c0_19 = arith.constant 0 : index
      %c0_20 = arith.constant 0 : index
      %46 = vector.load %arg8[%c0_19, %c0_20] : memref<8x896xf32, #tpu.memory_space<vmem>>, vector<8x896xf32>
      tpu.vector_store %arg8[%c0_19, %c0_20], %45 {strides = array<i32>} : memref<8x896xf32, #tpu.memory_space<vmem>>, vector<8x896xf32>,
    } else {
    }
    %c0 = arith.constant 0 : index
    %c0_1 = arith.constant 0 : index
    %3 = vector.load %arg3[%c0, %c0_1] : memref<8x896xbf16, #tpu.memory_space<vmem>>, vector<8x896xbf16>
    %4 = arith.extf %3 : vector<8x896xbf16> to vector<8x896xf32>
    %c0_2 = arith.constant 0 : index
    %c0_3 = arith.constant 0 : index
    %5 = vector.load %arg4[%c0_2, %c0_3] : memref<8x896xbf16, #tpu.memory_space<vmem>>, vector<8x896xbf16>
    %6 = arith.extf %5 : vector<8x896xbf16> to vector<8x896xf32>
    %cst = arith.constant 0.000000e+00 : f32
    %7 = vector.broadcast %cst : f32 to vector<8x896xf32>
    %8 = arith.maximumf %4, %7 : vector<8x896xf32>
    %9 = arith.mulf %4, %6 : vector<8x896xf32>
    %10 = arith.subf %8, %9 : vector<8x896xf32>
    %11 = math.absf %4 : vector<8x896xf32>
    %cst_4 = arith.constant 0.000000e+00 : f32
    %12 = vector.broadcast %cst_4 : f32 to vector<8x896xf32>
    %13 = arith.subf %12, %11 : vector<8x896xf32>
    %14 = math.exp %13 : vector<8x896xf32>
    %15 = math.log1p %14 : vector<8x896xf32>
    %16 = arith.addf %10, %15 : vector<8x896xf32>
    %c0_5 = arith.constant 0 : index
    %17 = memref.load %arg2[%c0_5] : memref<3xf32, #tpu.memory_space<smem>>
    %c1 = arith.constant 1 : index
    %18 = memref.load %arg2[%c1] : memref<3xf32, #tpu.memory_space<smem>>
    %c2 = arith.constant 2 : index
    %19 = memref.load %arg2[%c2] : memref<3xf32, #tpu.memory_space<smem>>
    %c0_6 = arith.constant 0 : index
    %c0_7 = arith.constant 0 : index
    %20 = vector.load %arg5[%c0_6, %c0_7] : memref<8x896xbf16, #tpu.memory_space<vmem>>, vector<8x896xbf16>
    %21 = arith.extf %20 : vector<8x896xbf16> to vector<8x896xf32>
    %22 = vector.broadcast %17 : f32 to vector<8x896xf32>
    %23 = arith.mulf %22, %21 : vector<8x896xf32>
    %c0_8 = arith.constant 0 : index
    %c0_9 = arith.constant 0 : index
    %24 = vector.load %arg7[%c0_8, %c0_9] : memref<8x1xf32, #tpu.memory_space<vmem>>, vector<8x1xf32>
    %25 = vector.broadcast %18 : f32 to vector<8x1xf32>
    %26 = arith.mulf %25, %24 : vector<8x1xf32>
    %27 = vector.broadcast %26 : vector<8x1xf32> to vector<8x896xf32>
    %28 = arith.addf %23, %27 : vector<8x896xf32>
    %c0_10 = arith.constant 0 : index
    %c0_11 = arith.constant 0 : index
    %29 = vector.load %arg6[%c0_10, %c0_11] : memref<8x896xbf16, #tpu.memory_space<vmem>>, vector<8x896xbf16>
    %30 = arith.extf %29 : vector<8x896xbf16> to vector<8x896xf32>
    %31 = vector.broadcast %19 : f32 to vector<8x896xf32>
    %32 = arith.mulf %31, %30 : vector<8x896xf32>
    %33 = arith.addf %28, %32 : vector<8x896xf32>
    %34 = tpu.iota {dimensions = array<i32: 1>} : vector<8x896xi32>
    %c784_i32 = arith.constant 784 : i32
    %35 = vector.broadcast %c784_i32 : i32 to vector<8x896xi32>
    %36 = arith.cmpi slt, %34, %35 : vector<8x896xi32>
    %cst_12 = arith.constant 0.000000e+00 : f32
    %37 = vector.broadcast %cst_12 : f32 to vector<8x896xf32>
    %38 = arith.select %36, %33, %37 : vector<8x896xi1>, vector<8x896xf32>
    %39 = arith.mulf %16, %38 : vector<8x896xf32>
    %40 = vector.shape_cast %39 : vector<8x896xf32> to vector<1x8x896xf32>
    %c0_13 = arith.constant 0 : index
    %c0_14 = arith.constant 0 : index
    %41 = vector.load %arg8[%c0_13, %c0_14] : memref<8x896xf32, #tpu.memory_space<vmem>>, vector<8x896xf32>
    %cst_15 = arith.constant dense<0.000000e+00> : vector<8x896xf32>
    %42 = vector.multi_reduction <add>, %40, %cst_15 [0] : vector<1x8x896xf32> to vector<8x896xf32>
    %43 = arith.addf %41, %42 : vector<8x896xf32>
    %c0_16 = arith.constant 0 : index
    %c0_17 = arith.constant 0 : index
    %44 = vector.load %arg8[%c0_16, %c0_17] : memref<8x896xf32, #tpu.memory_space<vmem>>, vector<8x896xf32>
    tpu.vector_store %arg8[%c0_16, %c0_17], %43 {strides = array<i32>} : memref<8x896xf32, #tpu.memory_space<vmem>>, vector<8x896xf32>,
    return
  }
  func.func @transform_0(%arg0: i32, %arg1: i32, %arg2: memref<3xf32, #tpu.memory_space<smem>>) -> (i32, i32) {
    %c1_i32 = arith.constant 1 : i32
    %0 = arith.muli %arg0, %c1_i32 : i32
    %1 = arith.addi %0, %arg1 : i32
    %c0_i32 = arith.constant 0 : i32
    %c0_i32_0 = arith.constant 0 : i32
    return %1, %c0_i32 : i32, i32
  }
  func.func @transform_1(%arg0: i32, %arg1: i32, %arg2: memref<3xf32, #tpu.memory_space<smem>>) -> (i32, i32) {
    %c1_i32 = arith.constant 1 : i32
    %0 = arith.muli %arg0, %c1_i32 : i32
    %1 = arith.addi %0, %arg1 : i32
    %c0_i32 = arith.constant 0 : i32
    %c0_i32_0 = arith.constant 0 : i32
    return %1, %c0_i32 : i32, i32
  }
  func.func @transform_2(%arg0: i32, %arg1: i32, %arg2: memref<3xf32, #tpu.memory_space<smem>>) -> (i32, i32) {
    %c1_i32 = arith.constant 1 : i32
    %0 = arith.muli %arg0, %c1_i32 : i32
    %1 = arith.addi %0, %arg1 : i32
    %c0_i32 = arith.constant 0 : i32
    %c0_i32_0 = arith.constant 0 : i32
    return %1, %c0_i32 : i32, i32
  }
  func.func @transform_3(%arg0: i32, %arg1: i32, %arg2: memref<3xf32, #tpu.memory_space<smem>>) -> (i32, i32) {
    %c1_i32 = arith.constant 1 : i32
    %0 = arith.muli %arg0, %c1_i32 : i32
    %1 = arith.addi %0, %arg1 : i32
    %c0_i32 = arith.constant 0 : i32
    %c0_i32_0 = arith.constant 0 : i32
    return %1, %c0_i32 : i32, i32
  }
  func.func @transform_4(%arg0: i32, %arg1: i32, %arg2: memref<3xf32, #tpu.memory_space<smem>>) -> (i32, i32) {
    %c1_i32 = arith.constant 1 : i32
    %0 = arith.muli %arg0, %c1_i32 : i32
    %1 = arith.addi %0, %arg1 : i32
    %c0_i32 = arith.constant 0 : i32
    %c0_i32_0 = arith.constant 0 : i32
    return %1, %c0_i32 : i32, i32
  }
  func.func @transform_5(%arg0: i32, %arg1: i32, %arg2: memref<3xf32, #tpu.memory_space<smem>>) -> (i32, i32) {
    %c0_i32 = arith.constant 0 : i32
    %c0_i32_0 = arith.constant 0 : i32
    return %arg0, %c0_i32 : i32, i32
  }
}

</mosaic_0001>

<bundles_post_ra>
// kernel: tpu_custom_call.1
= control target key start
LH: loop header
LB: loop body
LE: loop exit
PB: predicated region body
PF: predicated region fallthrough
CT: control target
= control target key end

     0   :  { %s836_s0 = inlined_call_operand.vmem [shape: f32[3], index: 0, kind: input, shape index: {}]   ;;  %s837_s1 = inlined_call_operand.hbm [shape: bf16[8,896], index: 1, kind: input, shape index: {}]   ;;  %s838_s2 = inlined_call_operand.hbm [shape: bf16[8,896], index: 2, kind: input, shape index: {}]   ;;  %s839_s3 = inlined_call_operand.hbm [shape: bf16[8,896], index: 3, kind: input, shape index: {}]   ;;  %s840_s4 = inlined_call_operand.hbm [shape: bf16[8,896], index: 4, kind: input, shape index: {}]   ;;  %s841_s5 = inlined_call_operand.vmem [shape: f32[8,1], index: 5, kind: input, shape index: {}]   ;;  %s842_s6 = inlined_call_operand.hbm [shape: f32[8,896], index: 6, kind: output, shape index: {}]  }
   0x1   :  { %s11_s23 = sshll.u32 %s836_s0, 4  ;;  %s12_s23 = int_to_ptr.vmem [resolvable:$true] %s11_s23 }
   0x2   :  { %s446_s24 = scalar_lea.vmem %s12_s23, 16  ;;  %p451_p1 = scmp.lt.s32.totalorder %s12_s23, %s12_s23 }
   0x3   :  { %p447_p0 = scmp.ne.s32.totalorder %s12_s23, %s446_s24  ;;  %p452_p2 = scmp.lt.s32.totalorder %s446_s24, %s446_s24 }
   0x5   :  { %p453_p3 = por %p452_p2, %p451_p1 }
   0x7   :  { %p454_p4 = pnand %p453_p3, %p447_p0 }
   0x9   :  { %457 = shalt.err (!%p454_p4)  }
   0xa   :  { %s568_s25 = smov [#allocation3]  }
   0xb   :  { %14 = dma.vmem_to_smem %s12_s23, 16, %s568_s25, [#allocation2] }
   0xc   :  { %558 = dma.done.wait [#allocation2], 16 }
   0xd   :  { %559 = vsyncadd [#allocation2], 4294967280 }
   0xe   :  { %16 = sfence }
   0xf   :  { %17 = vsyncpa [#allocation5], 0 }
  0x10   :  { %18 = vsyncpa [#allocation8], 0 }
  0x11   :  { %19 = vsyncpa [#allocation11], 0 }
  0x12   :  { %20 = vsyncpa [#allocation6], 0  ;;  %s569_s26 = smov [#allocation7]   ;;  %s570_s0 = smov [#allocation4]  }
  0x13   :  { %s45_s27 = sshll.u32 %s569_s26, 4  ;;  %s31_s28 = sshll.u32 %s570_s0, 4  ;;  %s46_s27 = int_to_ptr.vmem [resolvable:$true] %s45_s27  ;;  %s32_s28 = int_to_ptr.vmem [resolvable:$true] %s31_s28 }
  0x14   :  { %s466_s29 = scalar_lea.vmem %s46_s27, 448  ;;  %p471_p6 = scmp.lt.s32.totalorder %s46_s27, %s46_s27 }
  0x15   :  { %p467_p5 = scmp.ne.s32.totalorder %s46_s27, %s466_s29  ;;  %p472_p7 = scmp.lt.s32.totalorder %s466_s29, %s466_s29 }
  0x17   :  { %p473_p8 = por %p472_p7, %p471_p6 }
  0x19   :  { %p474_p9 = pnand %p473_p8, %p467_p5 }
  0x1b   :  { %477 = shalt.err (!%p474_p9)
}
  0x1c   :  { %48 = dma.hbm_to_vmem [thread:$0]  %s838_s2, 448, %s46_s27, [#allocation8]  }
  0x1d   :  { %s486_s8 = scalar_lea.vmem %s32_s28, 448  ;;  %p491_p11 = scmp.lt.s32.totalorder %s32_s28, %s32_s28 }
  0x1e   :  { %p487_p10 = scmp.ne.s32.totalorder %s32_s28, %s486_s8  ;;  %p492_p12 = scmp.lt.s32.totalorder %s486_s8, %s486_s8 }
  0x20   :  { %p493_p13 = por %p492_p12, %p491_p11 }
  0x22   :  { %p494_p0 = pnand %p493_p13, %p487_p10 }
  0x24   :  { %497 = shalt.err (!%p494_p0)
}
  0x25   :  { %34 = dma.hbm_to_vmem [thread:$0]  %s837_s1, 448, %s32_s28, [#allocation5]  }
  0x26   :  { %s571_s11 = smov [#allocation9]   ;;  %s572_s13 = smov [#allocation10]  }
  0x27   :  { %s59_s12 = sshll.u32 %s571_s11, 4  ;;  %s73_s14 = sshll.u32 %s572_s13, 4  ;;  %s60_s12 = int_to_ptr.vmem [resolvable:$true] %s59_s12  ;;  %s74_s14 = int_to_ptr.vmem [resolvable:$true] %s73_s14 }
  0x28   :  { %s506_s15 = scalar_lea.vmem %s60_s12, 448  ;;  %p511_p2 = scmp.lt.s32.totalorder %s60_s12, %s60_s12 }
  0x29   :  { %p507_p1 = scmp.ne.s32.totalorder %s60_s12, %s506_s15  ;;  %p512_p3 = scmp.lt.s32.totalorder %s506_s15, %s506_s15 }
  0x2b   :  { %p513_p4 = por %p512_p3, %p511_p2 }
  0x2d   :  { %p514_p5 = pnand %p513_p4, %p507_p1 }
  0x2f   :  { %517 = shalt.err (!%p514_p5)
}
  0x30   :  { %62 = dma.hbm_to_vmem [thread:$0]  %s839_s3, 448, %s60_s12, [#allocation8]  }
  0x31   :  { %s526_s17 = scalar_lea.vmem %s74_s14, 448  ;;  %p531_p7 = scmp.lt.s32.totalorder %s74_s14, %s74_s14 }
  0x32   :  { %p527_p6 = scmp.ne.s32.totalorder %s74_s14, %s526_s17  ;;  %p532_p8 = scmp.lt.s32.totalorder %s526_s17, %s526_s17 }
  0x34   :  { %p533_p9 = por %p532_p8, %p531_p7 }
  0x36   :  { %p534_p10 = pnand %p533_p9, %p527_p6 }
  0x38   :  { %537 = shalt.err (!%p534_p10)
}
  0x39   :  { %76 = dma.hbm_to_vmem [thread:$0]  %s840_s4, 448, %s74_s14, [#allocation11]  }
  0x3a   :  { %560 = dma.done.wait [#allocation5], 448  }
  0x3b   :  { %561 = vsyncadd [#allocation5], 4294966848 }
  0x3c   :  { %562 = dma.done.wait [#allocation8], 896  }
  0x3d   :  { %563 = vsyncadd [#allocation8], 4294966400 }
  0x3e   :  { %564 = dma.done.wait [#allocation11], 448  }
  0x3f   :  { %565 = vsyncadd [#allocation11], 4294966848  ;;  %v573_v0 = vmov 0   ;;  %s407_s3 = sld [smem:[#allocation3 + $0x1]]  ;;  %v286_v1 = vld [vmem:[%s841_s5] sm:$0xff]  ;;  %v124_v5 = vld [vmem:[#allocation4 + $0x8] sm:$0xff]  ;;  %v327_v36 = vlaneseq }
  0x40   :  { %417 = vset.pattern.permute.xlu0 %v573_v0  ;;  %v123_v4 = vld [vmem:[#allocation4] sm:$0xff]  ;;  %v125_v7 = vld [vmem:[#allocation4 + $0x10] sm:$0xff]  ;;  %v632_v9 = vunpack.c.l.bf16 %v124_v5  ;;  %v634_v10 = vunpack.c.h.bf16 %v124_v5  ;;  %v126_v11 = vld [vmem:[#allocation4 + $0x18] sm:$0xf]  ;;  %s408_s4 = sld [smem:[#allocation3 + $0x2]]  ;;  %s574_s21 = smov [#allocation12]  }
  0x41   :  { %v628_v6 = vunpack.c.l.bf16 %v123_v4  ;;  %v630_v8 = vunpack.c.h.bf16 %v123_v4  ;;  %v636_v12 = vunpack.c.l.bf16 %v125_v7  ;;  %v639_v14 = vunpack.c.h.bf16 %v125_v7  ;;  %v653_v40 = vld [vmem:[#allocation9] sm:$0xff]  ;;  %v657_v42 = vld [vmem:[#allocation9 + $0x8] sm:$0xff]  ;;  %v661_v44 = vld [vmem:[#allocation9 + $0x10] sm:$0xff]  ;;  %s715_s5 = sld [smem:[#allocation3]]  ;;  %s390_s22 = sshll.u32 %s574_s21, 4  ;;  %s391_s22 = int_to_ptr.vmem [resolvable:$true] %s390_s22 }
  0x42   :  { %v168_v16 = vand.u32 2147483647, %v632_v9  ;;  %v643_v17 = vunpack.c.l.bf16 %v126_v11  ;;  %v169_v18 = vand.u32 2147483647, %v634_v10  ;;  %v328_v38 = vand.u32 127, %v327_v36  ;;  %v301_v45 = vld [vmem:[#allocation10] sm:$0xff]  ;;  %p543_p12 = scmp.lt.s32.totalorder %s391_s22, %s391_s22 }
  0x43   :  { %v166_v13 = vand.u32 2147483647, %v628_v6  ;;  %v167_v15 = vand.u32 2147483647, %v630_v8  ;;  %v170_v19 = vand.u32 2147483647, %v636_v12  ;;  %v271_v48 = vunpack.c.l.bf16 %v653_v40 }
  0x44   :  { %v171_v21 = vand.u32 2147483647, %v639_v14  ;;  %v175_v23 = vsub.f32 0.0, %v168_v16  ;;  %v172_v24 = vand.u32 2147483647, %v643_v17  ;;  %v176_v25 = vsub.f32 0.0, %v169_v18 }
  0x45   :  { %v287_v2 = vstv %s407_s3  ;;  %v173_v20 = vsub.f32 0.0, %v166_v13  ;;  %v174_v22 = vsub.f32 0.0, %v167_v15  ;;  %v177_v26 = vsub.f32 0.0, %v170_v19  ;;  %v302_v49 = vld [vmem:[#allocation10 + $0x8] sm:$0xff]  ;;  %v303_v56 = vld [vmem:[#allocation10 + $0x10] sm:$0xff]  ;;  %s538_s23 = scalar_lea.vmem %s391_s22, 896 }
  0x46   :  { %v288_v3 = vmul.f32 %v287_v2, %v286_v1  ;;  %v178_v28 = vsub.f32 0.0, %v171_v21  ;;  %v184_v30 = vmul.f32 1.442695, %v175_v23  ;;  %v179_v31 = vsub.f32 0.0, %v172_v24  ;;  %v676_v58 = vld [vmem:[#allocation9 + $0x18] sm:$0xf]  ;;  %p539_p11 = scmp.ne.s32.totalorder %s391_s22, %s538_s23  ;;  %p544_p13 = scmp.lt.s32.totalorder %s538_s23, %s538_s23 }
  0x47   :  { %v180_v27 = vmul.f32 1.442695, %v173_v20  ;;  %v182_v29 = vmul.f32 1.442695, %v174_v22  ;;  %v186_v32 = vmul.f32 1.442695, %v176_v25  ;;  %v272_v53 = vunpack.c.h.bf16 %v653_v40 }
  0x48   :  { %291 = vperm.xlu0 %417, %v288_v3   ;;  %v188_v33 = vmul.f32 1.442695, %v177_v26  ;;  %v190_v34 = vmul.f32 1.442695, %v178_v28  ;;  %v192_v35 = vmul.f32 1.442695, %v179_v31  ;;  %v273_v54 = vunpack.c.l.bf16 %v657_v42  ;;  %p545_p0 = por %p544_p13, %p543_p12 }
  0x49   :  { %418 = vpow2.f32 %v180_v27  ;;  %v667_v50 = vadd.s32 768, %v328_v38  ;;  %v274_v55 = vunpack.c.h.bf16 %v657_v42  ;;  %v305_v60 = vunpack.c.l.bf16 %v301_v45  ;;  %v682_v0 = vld [vmem:[#allocation10 + $0x18] sm:$0xf]  ;;  %v134_v7 = vld [vmem:[#allocation7] sm:$0xff]  ;;  %v135_v20 = vld [vmem:[#allocation7 + $0x8] sm:$0xff] }
  0x4a   :  { %420 = vpow2.f32 %v182_v29  ;;  %v306_v61 = vunpack.c.h.bf16 %v301_v45  ;;  %v307_v1 = vunpack.c.l.bf16 %v302_v49  ;;  %v684_v2 = vstv %s408_s4  ;;  %v136_v21 = vld [vmem:[#allocation7 + $0x10] sm:$0xff]  ;;  %v137_v25 = vld [vmem:[#allocation7 + $0x18] sm:$0xf]  ;;  %p546_p1 = pnand %p545_p0, %p539_p11 }
  0x4b   :  { %422 = vpow2.f32 %v184_v30  ;;  %v308_v4 = vunpack.c.h.bf16 %v302_v49  ;;  %v309_v5 = vunpack.c.l.bf16 %v303_v56  ;;  %v310_v16 = vunpack.c.h.bf16 %v303_v56 }
  0x4c   :  { %424 = vpow2.f32 %v186_v32  ;;  %v692_v19 = vmul.f32 %v684_v2, %v305_v60  ;;  %v696_v23 = vmul.f32 %v684_v2, %v306_v61  ;;  %v699_v24 = vmul.f32 %v684_v2, %v307_v1 }
  0x4d   :  { %426 = vpow2.f32 %v188_v33  ;;  %v138_v26 = vunpack.c.l.bf16 %v134_v7  ;;  %v702_v27 = vmul.f32 %v684_v2, %v308_v4  ;;  %v705_v28 = vmul.f32 %v684_v2, %v309_v5 }
  0x4e   :  { %428 = vpow2.f32 %v190_v34  ;;  %v139_v29 = vunpack.c.h.bf16 %v134_v7  ;;  %v708_v30 = vmul.f32 %v684_v2, %v310_v16  ;;  %v140_v31 = vunpack.c.l.bf16 %v135_v20 }
  0x4f   :  { %430 = vpow2.f32 %v192_v35  ;;  %v141_v32 = vunpack.c.h.bf16 %v135_v20  ;;  %v142_v33 = vunpack.c.l.bf16 %v136_v21  ;;  %v143_v34 = vunpack.c.h.bf16 %v136_v21 }
  0x50   :  { %v144_v35 = vunpack.c.l.bf16 %v137_v25  ;;  %v145_v36 = vmax.f32 %v628_v6, 0.0  ;;  %v146_v38 = vmax.f32 %v630_v8, 0.0  ;;  %v147_v45 = vmax.f32 %v632_v9, 0.0 }
  0x51   :  { %v152_v49 = vmul.f32 %v138_v26, %v628_v6  ;;  %v150_v56 = vmax.f32 %v639_v14, 0.0  ;;  %v155_v1 = vmul.f32 %v141_v32, %v634_v10  ;;  %v156_v6 = vmul.f32 %v142_v33, %v636_v12 }
  0x52   :  { %v157_v4 = vmul.f32 %v143_v34, %v639_v14  ;;  %vm341_vm6 = vcmp.lt.s32.totalorder %v667_v50, 784 }
  0x56   :  { %v649_v37 = vpop.eup %418 }
  0x57   :  { %v651_v39 = vpop.eup %420  ;;  %v194_v46 = vadd.f32 1.0, %v649_v37  ;;  %v197_v60 = vmul.f32 -0.5, %v649_v37  ;;  %v200_v16 = vand.u32 2147483647, %v649_v37 }
  0x58   :  { %v655_v41 = vpop.eup %422  ;;  %v203_v51 = vadd.f32 1.0, %v651_v39 }
  0x59   :  { %v659_v43 = vpop.eup %424  ;;  %v212_v57 = vadd.f32 1.0, %v655_v41  ;;  %432 = vlog2.f32 %v194_v46  ;;  %v148_v46 = vmax.f32 %v634_v10, 0.0  ;;  %v215_v5 = vmul.f32 -0.5, %v655_v41 }
  0x5a   :  { %v664_v47 = vpop.eup %426  ;;  %v221_v62 = vadd.f32 1.0, %v659_v43  ;;  %434 = vlog2.f32 %v203_v51  ;;  %v149_v51 = vmax.f32 %v636_v12, 0.0  ;;  %v224_v7 = vmul.f32 -0.5, %v659_v43 }
  0x5b   :  { %v670_v52 = vpop.eup %428  ;;  %v230_v3 = vadd.f32 1.0, %v664_v47  ;;  %436 = vlog2.f32 %v212_v57  ;;  %v153_v57 = vmul.f32 %v139_v29, %v630_v8  ;;  %v730_v8 = vmul.f32 %v144_v35, %v643_v17 }
  0x5c   :  { %v680_v63 = vpop.eup %430  ;;  %v239_v11 = vadd.f32 1.0, %v670_v52  ;;  %438 = vlog2.f32 %v221_v62  ;;  %v154_v62 = vmul.f32 %v140_v31, %v632_v9  ;;  %v233_v9 = vmul.f32 -0.5, %v664_v47 }
  0x5d   :  { %v248_v22 = vadd.f32 1.0, %v680_v63  ;;  %440 = vlog2.f32 %v230_v3  ;;  %v206_v3 = vmul.f32 -0.5, %v651_v39  ;;  %v736_v20 = vsub.f32 %v146_v38, %v153_v57 }
  0x5e   :  { %442 = vlog2.f32 %v239_v11  ;;  %v732_v11 = vsub.f32 %v145_v36, %v152_v49  ;;  %v198_v21 = vadd.f32 1.0, %v197_v60  ;;  %v209_v12 = vand.u32 2147483647, %v651_v39 }
  0x5f   :  { %444 = vlog2.f32 %v248_v22  ;;  %v242_v14 = vmul.f32 -0.5, %v670_v52  ;;  %v740_v25 = vsub.f32 %v147_v45, %v154_v62  ;;  %v742_v26 = vsub.f32 %v148_v46, %v155_v1 }
  0x60   :  { %v207_v29 = vadd.f32 1.0, %v206_v3  ;;  %v218_v31 = vand.u32 2147483647, %v655_v41  ;;  %v163_v33 = vsub.f32 %v149_v51, %v156_v6  ;;  %v216_v34 = vadd.f32 1.0, %v215_v5 }
  0x61   :  { %v225_v35 = vadd.f32 1.0, %v224_v7  ;;  %v251_v36 = vmul.f32 -0.5, %v680_v63  ;;  %v164_v49 = vsub.f32 %v150_v56, %v157_v4  ;;  %vm746_vm0 = vcmp.lt.f32.partialorder %v200_v16, 0.0004427343 }
  0x62   :  { %v234_v60 = vadd.f32 1.0, %v233_v9  ;;  %v278_v45 = vstv %s715_s5  ;;  %v199_v46 = vmul.f32 %v649_v37, %v198_v21  ;;  %vm752_vm1 = vcmp.lt.f32.partialorder %v209_v12, 0.0004427343 }
  0x63   :  { %v227_v51 = vand.u32 2147483647, %v659_v43  ;;  %v243_v3 = vadd.f32 1.0, %v242_v14  ;;  %v208_v5 = vmul.f32 %v651_v39, %v207_v29  ;;  %vm758_vm2 = vcmp.lt.f32.partialorder %v218_v31, 0.0004427343 }
  0x64   :  { %v236_v4 = vand.u32 2147483647, %v664_v47  ;;  %v245_v7 = vand.u32 2147483647, %v670_v52  ;;  %v217_v37 = vmul.f32 %v655_v41, %v216_v34  ;;  %v226_v16 = vmul.f32 %v659_v43, %v225_v35 }
  0x65   :  { %v252_v9 = vadd.f32 1.0, %v251_v36  ;;  %v254_v21 = vand.u32 2147483647, %v680_v63  ;;  %v235_v39 = vmul.f32 %v664_v47, %v234_v60  ;;  %v244_v59 = vmul.f32 %v670_v52, %v243_v3 }
  0x66   :  { %v433_v10 = vpop.eup %432  ;;  %vm769_vm3 = vcmp.lt.f32.partialorder %v227_v51, 0.0004427343  ;;  %vm773_vm4 = vcmp.lt.f32.partialorder %v236_v4, 0.0004427343  ;;  %vm777_vm5 = vcmp.lt.f32.partialorder %v245_v7, 0.0004427343  ;;  %v279_v47 = vmul.f32 %v278_v45, %v271_v48 }
  0x67   :  { %v435_v22 = vpop.eup %434  ;;  %v196_v14 = vmul.f32 0.6931472, %v433_v10  ;;  %v253_v52 = vmul.f32 %v680_v63, %v252_v9  ;;  %vm793_vm7 = vcmp.lt.f32.partialorder %v254_v21, 0.0004427343  ;;  %v282_v48 = vmul.f32 %v278_v45, %v274_v55 }
  0x68   :  { %v437_v32 = vpop.eup %436  ;;  %v205_v18 = vmul.f32 0.6931472, %v435_v22  ;;  %v280_v22 = vmul.f32 %v278_v45, %v272_v53  ;;  %v858_v57 = vunpack.c.l.bf16 %v661_v44  ;;  %v859_v55 = vunpack.c.h.bf16 %v661_v44 }
  0x69   :  { %v439_v38 = vpop.eup %438  ;;  %v214_v15 = vmul.f32 0.6931472, %v437_v32  ;;  %v281_v32 = vmul.f32 %v278_v45, %v273_v54  ;;  %v202_v34 = vsel %vm746_vm0, %v199_v46, %v196_v14 }
  0x6a   :  { %v441_v62 = vpop.eup %440  ;;  %v223_v29 = vmul.f32 0.6931472, %v439_v38  ;;  %v211_v35 = vsel %vm752_vm1, %v208_v5, %v205_v18  ;;  %v857_v18 = vmax.f32 %v643_v17, 0.0  ;;  %v283_v42 = vmul.f32 %v278_v45, %v858_v57 }
  0x6b   :  { %v443_v6 = vpop.eup %442  ;;  %v232_v31 = vmul.f32 0.6931472, %v441_v62  ;;  %v220_v40 = vsel %vm758_vm2, %v217_v37, %v214_v15  ;;  %v284_v60 = vmul.f32 %v278_v45, %v859_v55  ;;  %v860_v15 = vunpack.c.l.bf16 %v676_v58 }
  0x6c   :  { %v445_v12 = vpop.eup %444  ;;  %v241_v13 = vmul.f32 0.6931472, %v443_v6  ;;  %v229_v53 = vsel %vm769_vm3, %v226_v16, %v223_v29  ;;  %v165_v38 = vsub.f32 %v857_v18, %v730_v8  ;;  %v861_v62 = vunpack.c.l.bf16 %v682_v0 }
  0x6d   :  { %v250_v10 = vmul.f32 0.6931472, %v445_v12  ;;  %v238_v54 = vsel %vm773_vm4, %v235_v39, %v232_v31  ;;  %v285_v61 = vmul.f32 %v278_v45, %v860_v15  ;;  %v258_v17 = vadd.f32 %v211_v35, %v736_v20 }
  0x6e   :  { %v247_v63 = vsel %vm777_vm5, %v244_v59, %v241_v13  ;;  %v319_v46 = vmul.f32 %v684_v2, %v861_v62  ;;  %v257_v13 = vadd.f32 %v202_v34, %v732_v11  ;;  %v259_v1 = vadd.f32 %v220_v40, %v740_v25 }
  0x6f   :  { %v256_v59 = vsel %vm793_vm7, %v253_v52, %v250_v10  ;;  %v260_v44 = vadd.f32 %v229_v53, %v742_v26  ;;  %v261_v51 = vadd.f32 %v238_v54, %v163_v33  ;;  %v262_v3 = vadd.f32 %v247_v63, %v164_v49 }
  0x70   :  { %v263_v5 = vadd.f32 %v256_v59, %v165_v38 }
  0xc3   :  { %v292_v8 = vpop.permute.xlu0 %291 }
  0xc4   :  { %v294_v58 = vadd.f32 %v292_v8, %v279_v47  ;;  %v295_v45 = vadd.f32 %v292_v8, %v280_v22  ;;  %v296_v6 = vadd.f32 %v292_v8, %v281_v32  ;;  %v297_v0 = vadd.f32 %v292_v8, %v282_v48 }
  0xc5   :  { %v298_v2 = vadd.f32 %v292_v8, %v283_v42  ;;  %v299_v56 = vadd.f32 %v292_v8, %v284_v60  ;;  %v300_v4 = vadd.f32 %v292_v8, %v285_v61 }
  0xc6   :  { %v320_v7 = vadd.f32 %v692_v19, %v294_v58  ;;  %v321_v11 = vadd.f32 %v696_v23, %v295_v45  ;;  %v322_v20 = vadd.f32 %v699_v24, %v296_v6  ;;  %v323_v25 = vadd.f32 %v702_v27, %v297_v0 }
  0xc7   :  { %v324_v26 = vadd.f32 %v705_v28, %v298_v2  ;;  %v325_v33 = vadd.f32 %v708_v30, %v299_v56  ;;  %v326_v49 = vadd.f32 %v319_v46, %v300_v4 }
  0xc8   :  { %v349_v37 = vmul.f32 %v320_v7, %v257_v13  ;;  %v350_v16 = vmul.f32 %v321_v11, %v258_v17  ;;  %v351_v9 = vmul.f32 %v322_v20, %v259_v1  ;;  %v352_v21 = vmul.f32 %v323_v25, %v260_v44 }
  0xc9   :  { %v348_v12 = vsel %vm341_vm6, %v326_v49, 0.0  ;;  %v353_v14 = vmul.f32 %v324_v26, %v261_v51  ;;  %v354_v19 = vmul.f32 %v325_v33, %v262_v3 }
  0xca   :  { %v355_v23 = vmul.f32 %v348_v12, %v263_v5  ;;  %377 = vst [vmem:[#allocation12] sm:$0xff] %v349_v37  ;;  %378 = vst [vmem:[#allocation12 + $0x8] sm:$0xff] %v350_v16 }
  0xcb   :  { %379 = vst [vmem:[#allocation12 + $0x10] sm:$0xff] %v351_v9  ;;  %380 = vst [vmem:[#allocation12 + $0x18] sm:$0xff] %v352_v21 }
  0xcc   :  { %381 = vst [vmem:[#allocation12 + $0x20] sm:$0xff] %v353_v14  ;;  %382 = vst [vmem:[#allocation12 + $0x28] sm:$0xff] %v354_v19 }
  0xcd   :  { %383 = vst [vmem:[#allocation12 + $0x30] sm:$0xff] %v355_v23 }
  0xce   :  { %549 = shalt.err (!%p546_p1)
}
  0xcf   :  { %393 = dma.vmem_to_hbm [thread:$0]  %s391_s22, 896, %s842_s6, [#allocation6]  }
  0xd0   :  { %566 = dma.done.wait [#allocation6], 896  }
  0xd1   :  { %567 = vsyncadd [#allocation6], 4294966400 }
  0xd2   :  { %397 = vsyncpa [#allocation5], 1 }
  0xd3   :  { %398 = vsyncpa [#allocation8], 1 }
  0xd4   :  { %399 = vsyncpa [#allocation11], 1 }
  0xd5   :  { %400 = vsyncpa [#allocation6], 1 }

</bundles_post_ra>
